<compile_context>
chip_gen: v7x
topology: tpu7x:2x2x1
jax: 0.10.0
libtpu: 0.0.40
codegen_flags: <defaults>
</compile_context>

<pallas_src>
import functools
import numpy as np
import jax
import jax.numpy as jnp
from jax.experimental import pallas as pl
from jax.experimental.pallas import tpu as pltpu

NUM_CLASSES = 20
IGNORE_LABEL = 0          # config['dataset_params']['ignore_label']
LAMBDA_LOVASZ = 0.1       # config['train_params']['lambda_lovasz']
TILE_N = 2048             # points per grid step (lane axis); clamped for small N


def _round_up(x, m):
    return ((x + m - 1) // m) * m


def _ce_softmax_err_kernel(logits_ref, labels_ref, w_ref,
                           err_ref, fg_ref, nll_ref, wrow_ref,
                           *, ignore_label):
    # Class-major layout: classes on sublanes, points on lanes.
    x = logits_ref[...].astype(jnp.float32)          # (C, T)
    lbl = labels_ref[...]                            # (1, T) int32
    w = w_ref[...]                                   # (C, 1) f32

    # numerically-stable softmax / log-softmax over the class (sublane) axis
    m = jnp.max(x, axis=0, keepdims=True)            # (1, T)
    e = jnp.exp(x - m)                                # (C, T)
    s = jnp.sum(e, axis=0, keepdims=True)             # (1, T)
    inv_s = pl.reciprocal(s, approx=True)             # EUP; probas don't need exact div
    probas = e * inv_s                                 # (C, T)
    logp = (x - m) - jnp.log(s)                        # exact log for the CE term

    row = jax.lax.broadcasted_iota(jnp.int32, x.shape, 0)   # class index per sublane
    onehot = (row == lbl).astype(jnp.float32)                # (C, T)
    valid = lbl != ignore_label                              # (1, T) bool
    validf = valid.astype(jnp.float32)

    # weighted NLL with ignore_index (numerator / denominator of the weighted mean)
    w_lbl = jnp.sum(onehot * w, axis=0, keepdims=True)       # (1, T) weight[label]
    nll = -jnp.sum(logp * onehot, axis=0, keepdims=True)     # (1, T)
    nll_ref[...] = nll * w_lbl * validf
    wrow_ref[...] = w_lbl * validf

    # Lovasz inputs: fg one-hot and |fg - p|.  Ignored points are marked -1 so a
    # descending sort pushes them past every valid error.
    # NOTE: this relies on valid errors being >= 0 (|fg - p| is always >= 0);
    # do not switch to signed errors without revisiting the -1 sentinel.
    fg = onehot * validf
    fg_ref[...] = fg
    err = jnp.abs(fg - probas)
    err_ref[...] = jnp.where(valid, err, -1.0)


def _fused_ce_lovasz_terms(logits_t, labels2d, w_col, tile):
    C, Np = logits_t.shape
    kernel = functools.partial(_ce_softmax_err_kernel, ignore_label=IGNORE_LABEL)
    out_shapes = (
        jax.ShapeDtypeStruct((C, Np), jnp.float32),   # errors |fg - p| (-1 for ignored)
        jax.ShapeDtypeStruct((C, Np), jnp.float32),   # fg one-hot (0 for ignored)
        jax.ShapeDtypeStruct((1, Np), jnp.float32),   # weight[y] * nll, 0 if ignored
        jax.ShapeDtypeStruct((1, Np), jnp.float32),   # weight[y], 0 if ignored
    )
    return pl.pallas_call(
        kernel,
        out_shape=out_shapes,
        grid_spec=pltpu.PrefetchScalarGridSpec(
            num_scalar_prefetch=0,
            grid=(Np // tile,),
            in_specs=[
                pl.BlockSpec((C, tile), lambda i: (0, i)),
                pl.BlockSpec((1, tile), lambda i: (0, i)),
                pl.BlockSpec((C, 1), lambda i: (0, 0)),
            ],
            out_specs=[
                pl.BlockSpec((C, tile), lambda i: (0, i)),
                pl.BlockSpec((C, tile), lambda i: (0, i)),
                pl.BlockSpec((1, tile), lambda i: (0, i)),
                pl.BlockSpec((1, tile), lambda i: (0, i)),
            ],
        ),
        compiler_params=pltpu.CompilerParams(
            dimension_semantics=("parallel",)),   # point-tile axis shards across TCs (v7x)
    )(logits_t, labels2d, w_col)


def criterion_forward(data_dict, class_weights):
    logits = data_dict['logits'].astype(jnp.float32)    # [N, C]
    labels = data_dict['labels'].astype(jnp.int32)      # [N]  (.long() in torch)
    N, C = logits.shape

    # Tile size: large for big point clouds, clamped (and 128-aligned) for small N.
    tile = min(TILE_N, _round_up(N, 128))
    n_pad = _round_up(N, tile)

    # Pad with ignore_label rows (masked out by both losses) and flip to the
    # lane-dense class-major layout the kernel consumes/produces.
    logits_t = jnp.pad(logits, ((0, n_pad - N), (0, 0))).T            # (C, n_pad)
    labels2d = jnp.pad(labels, (0, n_pad - N),
                       constant_values=IGNORE_LABEL).reshape(1, n_pad)
    w_col = class_weights.astype(jnp.float32).reshape(C, 1)

    errs, fg, nll, wrow = _fused_ce_lovasz_terms(logits_t, labels2d, w_col, tile)

    # ---- weighted CE with ignore_index (reduction='mean' PyTorch semantics) ----
    # (If every point is ignored PyTorch produces a 0/0; we deliberately return 0.)
    loss_ce = jnp.sum(nll) / jnp.maximum(jnp.sum(wrow), 1e-12)

    # ---- Lovasz-softmax (classes='present', ignored points contribute 0) ----
    # TODO(synk): the per-class descending sort (torch.sort) has no clean Pallas
    # TPU equivalent; it stays in XLA, but as a single key/value sort that
    # co-sorts fg with the error key (no argsort + gathers).
    neg_key_sorted, fg_sorted = jax.lax.sort(
        (-errs, fg), dimension=-1, is_stable=False, num_keys=1)
    err_sorted = jnp.maximum(-neg_key_sorted, 0.0)   # ignored rows (-1) contribute 0

    gts = jnp.sum(fg_sorted, axis=1, keepdims=True)
    intersection = gts - jnp.cumsum(fg_sorted, axis=1)
    union = gts + jnp.cumsum(1.0 - fg_sorted, axis=1)
    jaccard = 1.0 - intersection / union
    grad = jnp.concatenate([jaccard[:, :1], jaccard[:, 1:] - jaccard[:, :-1]], axis=1)
    per_class = jnp.sum(err_sorted * grad, axis=1)   # [C]
    present = (gts[:, 0] > 0).astype(jnp.float32)    # skip absent classes
    loss_lovasz = jnp.sum(per_class * present) / jnp.maximum(jnp.sum(present), 1.0)

    loss_main = loss_ce + loss_lovasz * LAMBDA_LOVASZ
    out = dict(data_dict)
    out['loss_main_ce'] = loss_ce
    out['loss_main_lovasz'] = loss_lovasz
    out['loss'] = data_dict['loss'] + loss_main
    return out


if __name__ == "__main__":
    # ---- deterministic parameter init mimicking criterion.__init__ ----
    seg_num_per_class = np.arange(1, NUM_CLASSES + 1, dtype=np.float64) * 1000.0
    seg_labelweights = seg_num_per_class / np.sum(seg_num_per_class)
    seg_labelweights = np.power(np.amax(seg_labelweights) / seg_labelweights, 1.0 / 3.0)
    class_weights = jnp.asarray(seg_labelweights, dtype=jnp.float32)      # [C]

    # ---- deterministic example inputs (N deliberately NOT a tile multiple) ----
    N = 400
    key = jax.random.PRNGKey(0)
    k_logits, k_labels = jax.random.split(key)
    logits = jax.random.normal(k_logits, (N, NUM_CLASSES), dtype=jnp.float32)
    labels = jax.random.randint(k_labels, (N,), 0, NUM_CLASSES, dtype=jnp.int32)

    data_dict = {
        'logits': logits,
        'labels': labels,
        'loss': jnp.float32(0.0),
    }

    out = jax.jit(criterion_forward)(data_dict, class_weights)
    jax.block_until_ready(out['loss'])
    print("KERNEL_OK")
</pallas_src>

<mosaic_0001>
module attributes {stable_mosaic.version = 11 : i64} {
  func.func @_ce_softmax_err_kernel(%arg0: i32, %arg1: memref<20x512xf32, #tpu.memory_space<vmem>>, %arg2: memref<1x512xi32, #tpu.memory_space<vmem>>, %arg3: memref<20x1xf32, #tpu.memory_space<vmem>>, %arg4: memref<20x512xf32, #tpu.memory_space<vmem>>, %arg5: memref<20x512xf32, #tpu.memory_space<vmem>>, %arg6: memref<1x512xf32, #tpu.memory_space<vmem>>, %arg7: memref<1x512xf32, #tpu.memory_space<vmem>>) attributes {dimension_semantics = [#tpu.dimension_semantics<parallel>], iteration_bounds = array<i64: 1>, scalar_prefetch = 0 : i64, scratch_operands = 0 : i64, tpu.core_type = #tpu.core_type<tc>, window_params = [{transform_indices = @transform_0, window_bounds = array<i64: 20, 512>}, {transform_indices = @transform_1, window_bounds = array<i64: 1, 512>}, {pipeline_mode = #tpu.pipeline_mode<synchronous>, transform_indices = @transform_2, window_bounds = array<i64: 20, 1>}, {transform_indices = @transform_3, window_bounds = array<i64: 20, 512>}, {transform_indices = @transform_4, window_bounds = array<i64: 20, 512>}, {transform_indices = @transform_5, window_bounds = array<i64: 1, 512>}, {transform_indices = @transform_6, window_bounds = array<i64: 1, 512>}]} {
    %c0 = arith.constant 0 : index
    %c0_0 = arith.constant 0 : index
    %0 = vector.load %arg1[%c0, %c0_0] : memref<20x512xf32, #tpu.memory_space<vmem>>, vector<20x512xf32>
    %c0_1 = arith.constant 0 : index
    %c0_2 = arith.constant 0 : index
    %1 = vector.load %arg2[%c0_1, %c0_2] : memref<1x512xi32, #tpu.memory_space<vmem>>, vector<1x512xi32>
    %c0_3 = arith.constant 0 : index
    %c0_4 = arith.constant 0 : index
    %2 = vector.load %arg3[%c0_3, %c0_4] : memref<20x1xf32, #tpu.memory_space<vmem>>, vector<20x1xf32>
    %cst = arith.constant dense<0xFF800000> : vector<512xf32>
    %3 = vector.multi_reduction <maximumf>, %0, %cst [0] : vector<20x512xf32> to vector<512xf32>
    %4 = vector.shape_cast %3 : vector<512xf32> to vector<1x512xf32>
    %5 = vector.broadcast %4 : vector<1x512xf32> to vector<20x512xf32>
    %6 = arith.subf %0, %5 : vector<20x512xf32>
    %7 = math.exp %6 : vector<20x512xf32>
    %cst_5 = arith.constant dense<0.000000e+00> : vector<512xf32>
    %8 = vector.multi_reduction <add>, %7, %cst_5 [0] : vector<20x512xf32> to vector<512xf32>
    %9 = vector.shape_cast %8 : vector<512xf32> to vector<1x512xf32>
    %10 = tpu.reciprocal %9 {approx = true} : vector<1x512xf32> -> vector<1x512xf32>
    %11 = vector.broadcast %10 : vector<1x512xf32> to vector<20x512xf32>
    %12 = arith.mulf %7, %11 : vector<20x512xf32>
    %13 = vector.broadcast %4 : vector<1x512xf32> to vector<20x512xf32>
    %14 = arith.subf %0, %13 : vector<20x512xf32>
    %15 = math.log %9 : vector<1x512xf32>
    %16 = vector.broadcast %15 : vector<1x512xf32> to vector<20x512xf32>
    %17 = arith.subf %14, %16 : vector<20x512xf32>
    %18 = tpu.iota {dimensions = array<i32: 0>} : vector<20x512xi32>
    %19 = vector.broadcast %1 : vector<1x512xi32> to vector<20x512xi32>
    %20 = arith.cmpi eq, %18, %19 : vector<20x512xi32>
    %21 = arith.extui %20 : vector<20x512xi1> to vector<20x512xi32>
    %22 = arith.sitofp %21 : vector<20x512xi32> to vector<20x512xf32>
    %c0_i32 = arith.constant 0 : i32
    %23 = vector.broadcast %c0_i32 : i32 to vector<1x512xi32>
    %24 = arith.cmpi ne, %1, %23 : vector<1x512xi32>
    %25 = arith.extui %24 : vector<1x512xi1> to vector<1x512xi32>
    %26 = arith.sitofp %25 : vector<1x512xi32> to vector<1x512xf32>
    %27 = vector.broadcast %2 : vector<20x1xf32> to vector<20x512xf32>
    %28 = arith.mulf %22, %27 : vector<20x512xf32>
    %cst_6 = arith.constant dense<0.000000e+00> : vector<512xf32>
    %29 = vector.multi_reduction <add>, %28, %cst_6 [0] : vector<20x512xf32> to vector<512xf32>
    %30 = vector.shape_cast %29 : vector<512xf32> to vector<1x512xf32>
    %31 = arith.mulf %17, %22 : vector<20x512xf32>
    %cst_7 = arith.constant dense<0.000000e+00> : vector<512xf32>
    %32 = vector.multi_reduction <add>, %31, %cst_7 [0] : vector<20x512xf32> to vector<512xf32>
    %33 = vector.shape_cast %32 : vector<512xf32> to vector<1x512xf32>
    %cst_8 = arith.constant 0.000000e+00 : f32
    %34 = vector.broadcast %cst_8 : f32 to vector<1x512xf32>
    %35 = arith.subf %34, %33 : vector<1x512xf32>
    %36 = arith.mulf %35, %30 : vector<1x512xf32>
    %37 = arith.mulf %36, %26 : vector<1x512xf32>
    %c0_9 = arith.constant 0 : index
    %c0_10 = arith.constant 0 : index
    %38 = vector.load %arg6[%c0_9, %c0_10] : memref<1x512xf32, #tpu.memory_space<vmem>>, vector<1x512xf32>
    tpu.vector_store %arg6[%c0_9, %c0_10], %37 {strides = array<i32>} : memref<1x512xf32, #tpu.memory_space<vmem>>, vector<1x512xf32>,
    %39 = arith.mulf %30, %26 : vector<1x512xf32>
    %c0_11 = arith.constant 0 : index
    %c0_12 = arith.constant 0 : index
    %40 = vector.load %arg7[%c0_11, %c0_12] : memref<1x512xf32, #tpu.memory_space<vmem>>, vector<1x512xf32>
    tpu.vector_store %arg7[%c0_11, %c0_12], %39 {strides = array<i32>} : memref<1x512xf32, #tpu.memory_space<vmem>>, vector<1x512xf32>,
    %41 = vector.broadcast %26 : vector<1x512xf32> to vector<20x512xf32>
    %42 = arith.mulf %22, %41 : vector<20x512xf32>
    %c0_13 = arith.constant 0 : index
    %c0_14 = arith.constant 0 : index
    %43 = vector.load %arg5[%c0_13, %c0_14] : memref<20x512xf32, #tpu.memory_space<vmem>>, vector<20x512xf32>
    tpu.vector_store %arg5[%c0_13, %c0_14], %42 {strides = array<i32>} : memref<20x512xf32, #tpu.memory_space<vmem>>, vector<20x512xf32>,
    %44 = arith.subf %42, %12 : vector<20x512xf32>
    %45 = math.absf %44 : vector<20x512xf32>
    %cst_15 = arith.constant -1.000000e+00 : f32
    %46 = vector.shape_cast %24 : vector<1x512xi1> to vector<1x512xi1>
    %47 = vector.broadcast %46 : vector<1x512xi1> to vector<20x512xi1>
    %48 = vector.broadcast %cst_15 : f32 to vector<20x512xf32>
    %49 = arith.select %47, %45, %48 : vector<20x512xi1>, vector<20x512xf32>
    %c0_16 = arith.constant 0 : index
    %c0_17 = arith.constant 0 : index
    %50 = vector.load %arg4[%c0_16, %c0_17] : memref<20x512xf32, #tpu.memory_space<vmem>>, vector<20x512xf32>
    tpu.vector_store %arg4[%c0_16, %c0_17], %49 {strides = array<i32>} : memref<20x512xf32, #tpu.memory_space<vmem>>, vector<20x512xf32>,
    return
  }
  func.func @transform_0(%arg0: i32) -> (i32, i32) {
    %c0_i32 = arith.constant 0 : i32
    %c0_i32_0 = arith.constant 0 : i32
    return %c0_i32, %arg0 : i32, i32
  }
  func.func @transform_1(%arg0: i32) -> (i32, i32) {
    %c0_i32 = arith.constant 0 : i32
    %c0_i32_0 = arith.constant 0 : i32
    return %c0_i32, %arg0 : i32, i32
  }
  func.func @transform_2(%arg0: i32) -> (i32, i32) {
    %c0_i32 = arith.constant 0 : i32
    %c0_i32_0 = arith.constant 0 : i32
    %c0_i32_1 = arith.constant 0 : i32
    return %c0_i32, %c0_i32_0 : i32, i32
  }
  func.func @transform_3(%arg0: i32) -> (i32, i32) {
    %c0_i32 = arith.constant 0 : i32
    %c0_i32_0 = arith.constant 0 : i32
    return %c0_i32, %arg0 : i32, i32
  }
  func.func @transform_4(%arg0: i32) -> (i32, i32) {
    %c0_i32 = arith.constant 0 : i32
    %c0_i32_0 = arith.constant 0 : i32
    return %c0_i32, %arg0 : i32, i32
  }
  func.func @transform_5(%arg0: i32) -> (i32, i32) {
    %c0_i32 = arith.constant 0 : i32
    %c0_i32_0 = arith.constant 0 : i32
    return %c0_i32, %arg0 : i32, i32
  }
  func.func @transform_6(%arg0: i32) -> (i32, i32) {
    %c0_i32 = arith.constant 0 : i32
    %c0_i32_0 = arith.constant 0 : i32
    return %c0_i32, %arg0 : i32, i32
  }
}

</mosaic_0001>

<bundles_post_ra>
// kernel: neg.2
= control target key start
LH: loop header
LB: loop body
LE: loop exit
PB: predicated region body
PF: predicated region fallthrough
CT: control target
= control target key end

     0   :  { %s200_s0 = inlined_call_operand.vmem [shape: f32[20,512], index: 0, kind: input, shape index: {}]   ;;  %s201_s1 = inlined_call_operand.vmem [shape: f32[20,512], index: 1, kind: output, shape index: {}]  }
   0x1   :  { %v2_v0 = vld [vmem:[%s200_s0] sm:$0xff]  ;;  %v100_v6 = vld [vmem:[%s200_s0 + $0x8] sm:$0xff]  ;;  %v106_v12 = vld [vmem:[%s200_s0 + $0x10] sm:$0xff] }
   0x2   :  { %v96_v1 = vld [vmem:[%s200_s0 + $0x20] sm:$0xff]  ;;  %v5_v3 = vxor.u32 2147483648, %v2_v0  ;;  %v102_v7 = vld [vmem:[%s200_s0 + $0x28] sm:$0xff]  ;;  %v28_v9 = vxor.u32 2147483648, %v100_v6  ;;  %v108_v13 = vld [vmem:[%s200_s0 + $0x30] sm:$0xff]  ;;  %v52_v15 = vxor.u32 2147483648, %v106_v12 }
   0x3   :  { %v98_v2 = vld [vmem:[%s200_s0 + $0x40] sm:$0xff]  ;;  %v12_v4 = vxor.u32 2147483648, %v96_v1  ;;  %v104_v8 = vld [vmem:[%s200_s0 + $0x48] sm:$0xff]  ;;  %v36_v10 = vxor.u32 2147483648, %v102_v7  ;;  %v110_v14 = vld [vmem:[%s200_s0 + $0x50] sm:$0xff]  ;;  %v60_v16 = vxor.u32 2147483648, %v108_v13 }
   0x4   :  { %v20_v5 = vxor.u32 2147483648, %v98_v2  ;;  %v44_v11 = vxor.u32 2147483648, %v104_v8  ;;  %7 = vst [vmem:[%s201_s1] sm:$0xff] %v5_v3  ;;  %v68_v17 = vxor.u32 2147483648, %v110_v14  ;;  %v112_v18 = vld [vmem:[%s200_s0 + $0x18] sm:$0xff]  ;;  %101 = vst [vmem:[%s201_s1 + $0x8] sm:$0xff] %v28_v9 }
   0x5   :  { %97 = vst [vmem:[%s201_s1 + $0x20] sm:$0xff] %v12_v4  ;;  %v114_v19 = vld [vmem:[%s200_s0 + $0x38] sm:$0xff]  ;;  %103 = vst [vmem:[%s201_s1 + $0x28] sm:$0xff] %v36_v10  ;;  %v76_v21 = vxor.u32 2147483648, %v112_v18 }
   0x6   :  { %99 = vst [vmem:[%s201_s1 + $0x40] sm:$0xff] %v20_v5  ;;  %v116_v20 = vld [vmem:[%s200_s0 + $0x58] sm:$0xff]  ;;  %105 = vst [vmem:[%s201_s1 + $0x48] sm:$0xff] %v44_v11  ;;  %v84_v22 = vxor.u32 2147483648, %v114_v19 }
   0x7   :  { %v92_v23 = vxor.u32 2147483648, %v116_v20  ;;  %107 = vst [vmem:[%s201_s1 + $0x10] sm:$0xff] %v52_v15  ;;  %109 = vst [vmem:[%s201_s1 + $0x30] sm:$0xff] %v60_v16 }
   0x8   :  { %111 = vst [vmem:[%s201_s1 + $0x50] sm:$0xff] %v68_v17  ;;  %113 = vst [vmem:[%s201_s1 + $0x18] sm:$0xff] %v76_v21 }
   0x9   :  { %115 = vst [vmem:[%s201_s1 + $0x38] sm:$0xff] %v84_v22  ;;  %117 = vst [vmem:[%s201_s1 + $0x58] sm:$0xff] %v92_v23 }

// kernel: criterion_forward.1
= control target key start
LH: loop header
LB: loop body
LE: loop exit
PB: predicated region body
PF: predicated region fallthrough
CT: control target
= control target key end

     0   :  { %v1223_v0 = vlaneseq  ;;  %v616_v1 = vmov 0   ;;  %v617_v9 = vmov 0.0   ;;  %vm35_vm1 = vcmask 1043456   ;;  %s1216_s1 = inlined_call_operand.vmem [shape: s32[1,512], index: 1, kind: input, shape index: {}]   ;;  %s1217_s2 = inlined_call_operand.vmem [shape: f32[20,1], index: 2, kind: input, shape index: {}]   ;;  %s1218_s0 = inlined_call_operand.vmem [shape: f32[20,512], index: 0, kind: input, shape index: {}]   ;;  %s1219_s4 = inlined_call_operand.vmem [shape: f32[20,512], index: 4, kind: output, shape index: {1}]   ;;  %s1220_s3 = inlined_call_operand.vmem [shape: f32[20,512], index: 3, kind: output, shape index: {0}]   ;;  %s1221_s6 = inlined_call_operand.vmem [shape: f32[1,512], index: 6, kind: output, shape index: {3}]   ;;  %s1222_s5 = inlined_call_operand.vmem [shape: f32[1,512], index: 5, kind: output, shape index: {2}]  }
   0x1   :  { %574 = vset.pattern.permute.xlu0 %v616_v1  ;;  %v30_v2 = vld [vmem:[%s1216_s1] sm:$0xf]  ;;  %575 = vset.pattern.permute.xlu1 %v616_v1  ;;  %v32_v5 = vld [vmem:[%s1217_s2 + $0x8] sm:$0xff]  ;;  %v33_v6 = vld [vmem:[%s1217_s2 + $0x10] sm:$0xf] }
   0x2   :  { %v31_v3 = vld [vmem:[%s1217_s2] sm:$0xff]  ;;  %v661_v4 = vshrl.u32 %v1223_v0, 7  ;;  %vm235_vm0 = vcmp.ne.s32.totalorder %v30_v2, 0  ;;  %250 = vperm.xlu1 %575, %v33_v6   ;;  %v680_v11 = vld [vmem:[%s1218_s0 + $0x8] sm:$0xff]  ;;  %v685_v12 = vld [vmem:[%s1218_s0 + $0x10] sm:$0xff] }
   0x3   :  { %240 = vperm.xlu0 %574, %v31_v3   ;;  %v672_v7 = vld [vmem:[%s1218_s0] sm:$0xff]  ;;  %v674_v8 = vsel %vm235_vm0, 1, %v616_v1  ;;  %v570_v10 = vsel %vm235_vm0, 1.0, %v617_v9  ;;  %v704_v17 = vld [vmem:[%s1218_s0 + $0x18] sm:$0xff]  ;;  %v709_v18 = vld [vmem:[%s1218_s0 + $0x28] sm:$0xff] }
   0x4   :  { %1255 = vst [vmem:[#allocation2_spill] sm:$0xff] %v661_v4  ;;  %v690_v13 = vld [vmem:[%s1218_s0 + $0x20] sm:$0xff]  ;;  %v693_v14 = vsub.s32 0, %v661_v4  ;;  %v696_v15 = vsub.s32 1, %v661_v4  ;;  %v699_v16 = vsub.s32 2, %v661_v4  ;;  %v714_v19 = vld [vmem:[%s1218_s0 + $0x30] sm:$0xff]  ;;  %v44_v26 = vmax.f32 %v680_v11, %v709_v18 }
   0x5   :  { %v717_v20 = vsub.s32 3, %v661_v4  ;;  %v722_v21 = vld [vmem:[%s1218_s0 + $0x38] sm:$0xff]  ;;  %v727_v22 = vld [vmem:[%s1218_s0 + $0x40] sm:$0xf]  ;;  %v732_v23 = vld [vmem:[%s1218_s0 + $0x48] sm:$0xf]  ;;  %v34_v25 = vmax.f32 %v672_v7, %v690_v13  ;;  %v53_v27 = vmax.f32 %v685_v12, %v714_v19 }
   0x6   :  { %v737_v24 = vld [vmem:[%s1218_s0 + $0x50] sm:$0xf]  ;;  %v746_v28 = vadd.s32 8, %v661_v4  ;;  %v759_v33 = vld [vmem:[%s1218_s0 + $0x58] sm:$0xf]  ;;  %v36_v34 = vsel %vm35_vm1, %v727_v22, -inf  ;;  %v62_v37 = vmax.f32 %v704_v17, %v722_v21  ;;  %v770_v38 = vrot.slane %v570_v10, %v693_v14 }
   0x7   :  { %245 = vperm.xlu0 %574, %v32_v5   ;;  %v45_v35 = vsel %vm35_vm1, %v732_v23, -inf  ;;  %v54_v36 = vsel %vm35_vm1, %v737_v24, -inf  ;;  %v773_v39 = vrot.slane %v570_v10, %v696_v15  ;;  %v776_v40 = vrot.slane %v570_v10, %v699_v16 }
   0x8   :  { %1256 = vst [vmem:[#allocation3_spill] sm:$0xff] %v770_v38  ;;  %v779_v41 = vrot.slane %v570_v10, %v717_v20  ;;  %v37_v42 = vmax.f32 %v34_v25, %v36_v34  ;;  %v46_v43 = vmax.f32 %v44_v26, %v45_v35  ;;  %v55_v44 = vmax.f32 %v53_v27, %v54_v36 }
   0x9   :  { %1257 = vst [vmem:[#allocation4_spill] sm:$0xff] %v773_v39  ;;  %1258 = vst [vmem:[#allocation5_spill] sm:$0xff] %v776_v40  ;;  %v63_v45 = vsel %vm35_vm1, %v759_v33, -inf  ;;  %v784_v47 = vrot.slane %v30_v2, %v693_v14  ;;  %v787_v48 = vrot.slane %v30_v2, %v696_v15  ;;  %v790_v49 = vrot.slane %v30_v2, %v699_v16 }
   0xa   :  { %1259 = vst [vmem:[#allocation6_spill] sm:$0xff] %v779_v41  ;;  %v64_v46 = vmax.f32 %v62_v37, %v63_v45  ;;  %v38_v50 = vrot.slane %v37_v42, 4  ;;  %v47_v51 = vrot.slane %v46_v43, 4  ;;  %v56_v52 = vrot.slane %v55_v44, 4 }
   0xb   :  { %v793_v53 = vrot.slane %v30_v2, %v717_v20  ;;  %vm199_vm2 = vcmp.eq.s32.totalorder %v661_v4, %v784_v47  ;;  %vm200_vm3 = vcmp.eq.s32.totalorder %v661_v4, %v787_v48  ;;  %vm201_vm4 = vcmp.eq.s32.totalorder %v661_v4, %v790_v49 }
   0xc   :  { %v65_v54 = vrot.slane %v64_v46, 4  ;;  %v39_v55 = vmax.f32 %v37_v42, %v38_v50  ;;  %v48_v56 = vmax.f32 %v46_v43, %v47_v51  ;;  %v57_v57 = vmax.f32 %v55_v44, %v56_v52 }
   0xd   :  { %vm202_vm5 = vcmp.eq.s32.totalorder %v661_v4, %v793_v53  ;;  %v804_v59 = vsel %vm199_vm2, 1.0, %v617_v9  ;;  %v807_v60 = vsel %vm200_vm3, 1.0, %v617_v9  ;;  %v810_v61 = vsel %vm201_vm4, 1.0, %v617_v9 }
   0xe   :  { %v66_v58 = vmax.f32 %v64_v46, %v65_v54  ;;  %v40_v62 = vrot.slane %v39_v55, 2  ;;  %v49_v63 = vrot.slane %v48_v56, 2  ;;  %v58_v1 = vrot.slane %v57_v57, 2 }
   0xf   :  { %v813_v2 = vsel %vm202_vm5, 1.0, %v617_v9  ;;  %v817_v5 = vmul.f32 %v804_v59, %v770_v38  ;;  %v821_v6 = vmul.f32 %v807_v60, %v773_v39  ;;  %v825_v10 = vmul.f32 %v810_v61, %v776_v40 }
  0x10   :  { %v67_v3 = vrot.slane %v66_v58, 2  ;;  %v41_v25 = vmax.f32 %v39_v55, %v40_v62  ;;  %v50_v26 = vmax.f32 %v48_v56, %v49_v63  ;;  %v59_v27 = vmax.f32 %v57_v57, %v58_v1 }
  0x11   :  { %v829_v34 = vmul.f32 %v813_v2, %v779_v41  ;;  %462 = vst [vmem:[%s1219_s4] sm:$0xff] %v817_v5  ;;  %463 = vst [vmem:[%s1219_s4 + $0x8] sm:$0xff] %v821_v6  ;;  %vm203_vm6 = vcmp.eq.s32.totalorder %v746_v28, %v784_v47  ;;  %vm204_vm7 = vcmp.eq.s32.totalorder %v746_v28, %v787_v48 }
  0x12   :  { %v68_v35 = vmax.f32 %v66_v58, %v67_v3  ;;  %464 = vst [vmem:[%s1219_s4 + $0x10] sm:$0xff] %v825_v10  ;;  %vm205_vm8 = vcmp.eq.s32.totalorder %v746_v28, %v790_v49  ;;  %v42_v36 = vrot.slane %v41_v25, 1  ;;  %v51_v37 = vrot.slane %v50_v26, 1 }
  0x13   :  { %v60_v42 = vrot.slane %v59_v27, 1  ;;  %465 = vst [vmem:[%s1219_s4 + $0x18] sm:$0xff] %v829_v34  ;;  %vm206_vm9 = vcmp.eq.s32.totalorder %v746_v28, %v793_v53  ;;  %v856_v44 = vsel %vm203_vm6, 1.0, %v617_v9  ;;  %v859_v45 = vsel %vm204_vm7, 1.0, %v617_v9 }
  0x14   :  { %v69_v43 = vrot.slane %v68_v35, 1  ;;  %v43_v46 = vmax.f32 %v41_v25, %v42_v36  ;;  %v52_v50 = vmax.f32 %v50_v26, %v51_v37  ;;  %v862_v52 = vsel %vm205_vm8, 1.0, %v617_v9 }
  0x15   :  { %v61_v51 = vmax.f32 %v59_v27, %v60_v42  ;;  %1260 = vst [vmem:[#allocation7_spill] sm:$0xff] %v862_v52  ;;  %v866_v55 = vmul.f32 %v856_v44, %v770_v38  ;;  %v870_v56 = vmul.f32 %v859_v45, %v773_v39  ;;  %v874_v57 = vmul.f32 %v862_v52, %v776_v40 }
  0x16   :  { %v70_v54 = vmax.f32 %v68_v35, %v69_v43  ;;  %v877_v58 = vsub.f32 %v672_v7, %v43_v46  ;;  %v880_v62 = vsub.f32 %v680_v11, %v52_v50  ;;  %v889_v3 = vsub.f32 %v690_v13, %v43_v46 }
  0x17   :  { %v883_v63 = vsub.f32 %v685_v12, %v61_v51  ;;  %466 = vst [vmem:[%s1219_s4 + $0x20] sm:$0xff] %v866_v55  ;;  %467 = vst [vmem:[%s1219_s4 + $0x28] sm:$0xff] %v870_v56  ;;  %v904_v7 = vsub.f32 %v709_v18, %v52_v50  ;;  %v907_v11 = vsub.f32 %v714_v19, %v61_v51  ;;  %v913_v12 = vsel %vm206_vm9, 1.0, %v617_v9 }
  0x18   :  { %v886_v1 = vsub.f32 %v704_v17, %v70_v54  ;;  %468 = vst [vmem:[%s1219_s4 + $0x30] sm:$0xff] %v874_v57  ;;  %1261 = vst [vmem:[#allocation8_spill] sm:$0xff] %v913_v12  ;;  %v83_v13 = vmul.f32 1.442695, %v877_v58  ;;  %v85_v17 = vmul.f32 1.442695, %v880_v62  ;;  %v920_v26 = vmul.f32 %v913_v12, %v779_v41 }
  0x19   :  { %v87_v25 = vmul.f32 1.442695, %v883_v63  ;;  %v923_v18 = vsub.f32 %v722_v21, %v70_v54  ;;  %v926_v19 = vsub.f32 %v727_v22, %v43_v46  ;;  %v929_v28 = vsub.f32 %v732_v23, %v52_v50 }
  0x1a   :  { %v89_v27 = vmul.f32 1.442695, %v886_v1  ;;  %576 = vpow2.f32 %v83_v13  ;;  %v91_v35 = vmul.f32 1.442695, %v889_v3  ;;  %469 = vst [vmem:[%s1219_s4 + $0x38] sm:$0xff] %v920_v26  ;;  %v938_v36 = vsub.f32 %v737_v24, %v61_v51 }
  0x1b   :  { %1262 = vst [vmem:[#allocation9_spill] sm:$0xff] %v926_v19  ;;  %1263 = vst [vmem:[#allocation10_spill] sm:$0xff] %v929_v28  ;;  %v941_v21 = vsub.f32 %v759_v33, %v70_v54  ;;  %578 = vpow2.f32 %v85_v17  ;;  %v93_v22 = vmul.f32 1.442695, %v904_v7  ;;  %v95_v23 = vmul.f32 1.442695, %v907_v11 }
  0x1c   :  { %1264 = vst [vmem:[#allocation11_spill] sm:$0xff] %v938_v36  ;;  %580 = vpow2.f32 %v87_v25  ;;  %v182_v37 = vadd.s32 16, %v661_v4  ;;  %v97_v42 = vmul.f32 1.442695, %v923_v18  ;;  %v99_v43 = vmul.f32 1.442695, %v926_v19 }
  0x1d   :  { %1265 = vst [vmem:[#allocation12_spill] sm:$0xff] %v941_v21  ;;  %582 = vpow2.f32 %v89_v27  ;;  %v101_v46 = vmul.f32 1.442695, %v929_v28  ;;  %v103_v24 = vmul.f32 1.442695, %v938_v36 }
  0x1e   :  { %584 = vpow2.f32 %v91_v35  ;;  %vm207_vm10 = vcmp.eq.s32.totalorder %v182_v37, %v784_v47  ;;  %vm208_vm11 = vcmp.eq.s32.totalorder %v182_v37, %v787_v48  ;;  %vm209_vm12 = vcmp.eq.s32.totalorder %v182_v37, %v790_v49 }
  0x1f   :  { %586 = vpow2.f32 %v93_v22  ;;  %v105_v33 = vmul.f32 1.442695, %v941_v21  ;;  %vm210_vm13 = vcmp.eq.s32.totalorder %v182_v37, %v793_v53  ;;  %v956_v50 = vsel %vm207_vm10, 1.0, %v617_v9 }
  0x20   :  { %588 = vpow2.f32 %v95_v23  ;;  %1266 = vst [vmem:[#allocation13_spill] sm:$0xff] %v956_v50  ;;  %v959_v51 = vsel %vm208_vm11, 1.0, %v617_v9  ;;  %v962_v47 = vsel %vm209_vm12, 1.0, %v617_v9  ;;  %v965_v48 = vsel %vm210_vm13, 1.0, %v617_v9 }
  0x21   :  { %1267 = vst [vmem:[#allocation14_spill] sm:$0xff] %v959_v51  ;;  %1268 = vst [vmem:[#allocation15_spill] sm:$0xff] %v962_v47  ;;  %590 = vpow2.f32 %v97_v42  ;;  %v969_v49 = vmul.f32 %v956_v50, %v770_v38  ;;  %v973_v53 = vmul.f32 %v959_v51, %v773_v39  ;;  %v977_v54 = vmul.f32 %v962_v47, %v776_v40 }
  0x22   :  { %1269 = vst [vmem:[#allocation16_spill] sm:$0xff] %v965_v48  ;;  %592 = vpow2.f32 %v99_v43  ;;  %v981_v13 = vmul.f32 %v965_v48, %v779_v41 }
  0x23   :  { %1270 = vst [vmem:[#allocation17_spill] sm:$0xff] %v969_v49  ;;  %1271 = vst [vmem:[#allocation18_spill] sm:$0xff] %v973_v53  ;;  %594 = vpow2.f32 %v101_v46 }
  0x24   :  { %1272 = vst [vmem:[#allocation19_spill] sm:$0xff] %v977_v54  ;;  %1273 = vst [vmem:[#allocation20_spill] sm:$0xff] %v981_v13  ;;  %v991_v9 = vpop.eup %576  ;;  %596 = vpow2.f32 %v103_v24 }
  0x25   :  { %470 = vst [vmem:[%s1219_s4 + $0x40] sm:$0xf] %v969_v49  ;;  %471 = vst [vmem:[%s1219_s4 + $0x48] sm:$0xf] %v973_v53  ;;  %v1001_v17 = vpop.eup %578  ;;  %598 = vpow2.f32 %v105_v33 }
  0x26   :  { %472 = vst [vmem:[%s1219_s4 + $0x50] sm:$0xf] %v977_v54  ;;  %473 = vst [vmem:[%s1219_s4 + $0x58] sm:$0xf] %v981_v13  ;;  %v1003_v25 = vpop.eup %580 }
  0x27   :  { %v1005_v27 = vpop.eup %582 }
  0x28   :  { %v585_v35 = vpop.eup %584 }
  0x29   :  { %v587_v22 = vpop.eup %586  ;;  %v107_v37 = vadd.f32 %v585_v35, %v991_v9 }
  0x2a   :  { %v1007_v23 = vpop.eup %588  ;;  %v116_v43 = vadd.f32 %v587_v22, %v1001_v17 }
  0x2b   :  { %v1010_v42 = vpop.eup %590  ;;  %v125_v24 = vadd.f32 %v1007_v23, %v1003_v25 }
  0x2c   :  { %v593_v46 = vpop.eup %592  ;;  %v134_v32 = vadd.f32 %v1010_v42, %v1005_v27 }
  0x2d   :  { %v595_v0 = vpop.eup %594  ;;  %v108_v33 = vsel %vm35_vm1, %v593_v46, 0.0 }
  0x2e   :  { %v1018_v31 = vpop.eup %596  ;;  %v109_v30 = vadd.f32 %v108_v33, %v107_v37  ;;  %v117_v29 = vsel %vm35_vm1, %v595_v0, 0.0 }
  0x2f   :  { %1274 = vst [vmem:[#allocation21_spill] sm:$0xff] %v1018_v31  ;;  %v1021_v41 = vpop.eup %598  ;;  %v118_v40 = vadd.f32 %v117_v29, %v116_v43  ;;  %v126_v39 = vsel %vm35_vm1, %v1018_v31, 0.0 }
  0x30   :  { %1275 = vst [vmem:[#allocation22_spill] sm:$0xff] %v1021_v41  ;;  %v110_v38 = vrot.slane %v109_v30, 4  ;;  %v127_v4 = vadd.f32 %v126_v39, %v125_v24  ;;  %v135_v48 = vsel %vm35_vm1, %v1021_v41, 0.0 }
  0x31   :  { %v119_v47 = vrot.slane %v118_v40, 4  ;;  %v136_v13 = vadd.f32 %v135_v48, %v134_v32 }
  0x32   :  { %v111_v54 = vadd.f32 %v110_v38, %v109_v30  ;;  %v128_v51 = vrot.slane %v127_v4, 4 }
  0x33   :  { %v120_v50 = vadd.f32 %v119_v47, %v118_v40  ;;  %v137_v53 = vrot.slane %v136_v13, 4  ;;  %v1276_v40 = vrot.slane %v674_v8, %v693_v14  ;;  %v1285_v14 = vrot.slane %v674_v8, %v717_v20 }
  0x34   :  { %v112_v37 = vrot.slane %v111_v54, 2  ;;  %v129_v33 = vadd.f32 %v128_v51, %v127_v4 }
  0x35   :  { %v121_v49 = vrot.slane %v120_v50, 2  ;;  %v138_v21 = vadd.f32 %v137_v53, %v136_v13  ;;  %vm1030_vm14 = vcmp.eq.s32.totalorder %v1276_v40, 1  ;;  %vm1051_vm2 = vcmp.eq.s32.totalorder %v1285_v14, 1 }
  0x36   :  { %v113_v36 = vadd.f32 %v112_v37, %v111_v54  ;;  %v130_v29 = vrot.slane %v129_v33, 2 }
  0x37   :  { %v122_v43 = vadd.f32 %v121_v49, %v120_v50  ;;  %v139_v28 = vrot.slane %v138_v21, 2 }
  0x38   :  { %v114_v19 = vrot.slane %v113_v36, 1  ;;  %v131_v31 = vadd.f32 %v130_v29, %v129_v33 }
  0x39   :  { %v123_v39 = vrot.slane %v122_v43, 1  ;;  %v140_v24 = vadd.f32 %v139_v28, %v138_v21 }
  0x3a   :  { %v115_v12 = vadd.f32 %v114_v19, %v113_v36  ;;  %v132_v41 = vrot.slane %v131_v31, 1 }
  0x3b   :  { %v124_v52 = vadd.f32 %v123_v39, %v122_v43  ;;  %v141_v32 = vrot.slane %v140_v24, 1 }
  0x3c   :  { %v133_v30 = vadd.f32 %v132_v41, %v131_v31  ;;  %600 = vrcp.f32 %v115_v12  ;;  %v1279_v31 = vrot.slane %v674_v8, %v696_v15 }
  0x3d   :  { %v142_v38 = vadd.f32 %v141_v32, %v140_v24  ;;  %602 = vrcp.f32 %v124_v52 }
  0x3e   :  { %604 = vrcp.f32 %v133_v30  ;;  %vm1037_vm15 = vcmp.eq.s32.totalorder %v1279_v31, 1 }
  0x3f   :  { %606 = vrcp.f32 %v142_v38 }
  0x40   :  { %608 = vlog2.f32 %v115_v12 }
  0x41   :  { %610 = vlog2.f32 %v124_v52  ;;  %v1282_v52 = vrot.slane %v674_v8, %v699_v16 }
  0x42   :  { %612 = vlog2.f32 %v133_v30 }
  0x43   :  { %614 = vlog2.f32 %v142_v38  ;;  %vm1044_vm0 = vcmp.eq.s32.totalorder %v1282_v52, 1 }
  0x46   :  { %v601_v4 = vpop.eup %600 }
  0x47   :  { %v603_v19 = vpop.eup %602  ;;  %v147_v15 = vmul.f32 %v601_v4, %v991_v9  ;;  %v151_v21 = vmul.f32 %v601_v4, %v585_v35  ;;  %v1059_v16 = vmul.f32 %v601_v4, %v593_v46 }
  0x48   :  { %v1056_v50 = vpop.eup %604  ;;  %v148_v51 = vmul.f32 %v603_v19, %v1001_v17  ;;  %v152_v47 = vmul.f32 %v603_v19, %v587_v22  ;;  %v1061_v48 = vmul.f32 %v603_v19, %v595_v0 }
  0x49   :  { %v1063_v49 = vpop.eup %606  ;;  %v149_v8 = vmul.f32 %v1056_v50, %v1003_v25  ;;  %v474_v20 = vsub.f32 %v817_v5, %v147_v15  ;;  %v153_v53 = vmul.f32 %v1056_v50, %v1007_v23  ;;  %v478_v54 = vsub.f32 %v866_v55, %v151_v21  ;;  %v1288_v21 = vld [vmem:[#allocation7_spill] sm:$0xff] }
  0x4a   :  { %v609_v13 = vpop.eup %608  ;;  %v150_v9 = vmul.f32 %v1063_v49, %v1005_v27  ;;  %v475_v17 = vsub.f32 %v821_v6, %v148_v51  ;;  %v154_v0 = vmul.f32 %v1063_v49, %v1010_v42  ;;  %v479_v35 = vsub.f32 %v870_v56, %v152_v47  ;;  %v1289_v51 = vld [vmem:[#allocation8_spill] sm:$0xff] }
  0x4b   :  { %v611_v22 = vpop.eup %610  ;;  %v1077_v25 = vmul.f32 0.6931472, %v609_v13  ;;  %v476_v5 = vsub.f32 %v825_v10, %v149_v8  ;;  %v486_v46 = vand.u32 2147483647, %v474_v20  ;;  %v480_v23 = vsub.f32 %v874_v57, %v153_v53 }
  0x4c   :  { %v613_v55 = vpop.eup %612  ;;  %v162_v37 = vmul.f32 0.6931472, %v611_v22  ;;  %v477_v33 = vsub.f32 %v829_v34, %v150_v9  ;;  %v487_v27 = vand.u32 2147483647, %v475_v17  ;;  %v481_v6 = vsub.f32 %v920_v26, %v154_v0  ;;  %v1290_v0 = vld [vmem:[#allocation21_spill] sm:$0xff] }
  0x4d   :  { %v615_v29 = vpop.eup %614  ;;  %v164_v43 = vmul.f32 0.6931472, %v613_v55  ;;  %v167_v56 = vsub.f32 %v877_v58, %v1077_v25  ;;  %v488_v42 = vand.u32 2147483647, %v476_v5  ;;  %v518_v39 = vsel %vm1030_vm14, %v486_v46, -1.0  ;;  %v1291_v5 = vld [vmem:[#allocation22_spill] sm:$0xff] }
  0x4e   :  { %v166_v10 = vmul.f32 0.6931472, %v615_v29  ;;  %v168_v24 = vsub.f32 %v880_v62, %v162_v37  ;;  %v489_v57 = vand.u32 2147483647, %v477_v33  ;;  %v519_v32 = vsel %vm1037_vm15, %v487_v27, -1.0  ;;  %530 = vst [vmem:[%s1220_s3] sm:$0xff] %v518_v39  ;;  %v1293_v33 = vld [vmem:[#allocation10_spill] sm:$0xff] }
  0x4f   :  { %v169_v34 = vsub.f32 %v883_v63, %v164_v43  ;;  %v301_v26 = vmul.f32 %v804_v59, %v167_v56  ;;  %v520_v58 = vsel %vm1044_vm0, %v488_v42, -1.0  ;;  %531 = vst [vmem:[%s1220_s3 + $0x8] sm:$0xff] %v519_v32  ;;  %v171_v62 = vsub.f32 %v889_v3, %v1077_v25  ;;  %v1295_v29 = vld [vmem:[#allocation12_spill] sm:$0xff]  ;;  %v1296_v42 = vld [vmem:[#allocation17_spill] sm:$0xff] }
  0x50   :  { %v170_v30 = vsub.f32 %v886_v1, %v166_v10  ;;  %v302_v38 = vmul.f32 %v807_v60, %v168_v24  ;;  %v521_v4 = vsel %vm1051_vm2, %v489_v57, -1.0  ;;  %532 = vst [vmem:[%s1220_s3 + $0x10] sm:$0xff] %v520_v58  ;;  %v172_v63 = vsub.f32 %v904_v7, %v162_v37  ;;  %v1297_v24 = vld [vmem:[#allocation18_spill] sm:$0xff]  ;;  %v1301_v58 = vld [vmem:[#allocation20_spill] sm:$0xff] }
  0x51   :  { %v303_v40 = vmul.f32 %v810_v61, %v169_v34  ;;  %533 = vst [vmem:[%s1220_s3 + $0x18] sm:$0xff] %v521_v4  ;;  %v173_v3 = vsub.f32 %v907_v11, %v164_v43  ;;  %v174_v1 = vsub.f32 %v923_v18, %v166_v10  ;;  %v305_v31 = vmul.f32 %v856_v44, %v171_v62  ;;  %v1299_v34 = vld [vmem:[#allocation14_spill] sm:$0xff]  ;;  %v1303_v4 = vld [vmem:[#allocation16_spill] sm:$0xff] }
  0x52   :  { %v304_v19 = vmul.f32 %v813_v2, %v170_v30  ;;  %v306_v52 = vmul.f32 %v859_v45, %v172_v63  ;;  %v490_v14 = vand.u32 2147483647, %v478_v54  ;;  %v491_v15 = vand.u32 2147483647, %v479_v35  ;;  %v1302_v30 = vld [vmem:[#allocation15_spill] sm:$0xff] }
  0x53   :  { %v307_v7 = vmul.f32 %v1288_v21, %v173_v3  ;;  %v308_v47 = vmul.f32 %v1289_v51, %v174_v1  ;;  %v313_v8 = vadd.f32 %v305_v31, %v301_v26  ;;  %v492_v20 = vand.u32 2147483647, %v480_v23  ;;  %v1292_v23 = vld [vmem:[#allocation9_spill] sm:$0xff]  ;;  %v1300_v26 = vld [vmem:[#allocation19_spill] sm:$0xff] }
  0x54   :  { %v322_v53 = vadd.f32 %v306_v52, %v302_v38  ;;  %v493_v13 = vand.u32 2147483647, %v481_v6  ;;  %v522_v11 = vsel %vm1030_vm14, %v490_v14, -1.0  ;;  %v523_v18 = vsel %vm1037_vm15, %v491_v15, -1.0 }
  0x55   :  { %v331_v9 = vadd.f32 %v307_v7, %v303_v40  ;;  %v340_v17 = vadd.f32 %v308_v47, %v304_v19  ;;  %v524_v54 = vsel %vm1044_vm0, %v492_v20, -1.0  ;;  %534 = vst [vmem:[%s1220_s3 + $0x20] sm:$0xff] %v522_v11  ;;  %535 = vst [vmem:[%s1220_s3 + $0x28] sm:$0xff] %v523_v18  ;;  %v157_v35 = vmul.f32 %v1056_v50, %v1290_v0  ;;  %v1294_v50 = vld [vmem:[#allocation11_spill] sm:$0xff] }
  0x56   :  { %v525_v22 = vsel %vm1051_vm2, %v493_v13, -1.0  ;;  %536 = vst [vmem:[%s1220_s3 + $0x30] sm:$0xff] %v524_v54  ;;  %v158_v46 = vmul.f32 %v1063_v49, %v1291_v5  ;;  %v175_v55 = vsub.f32 %v1292_v23, %v1077_v25  ;;  %v176_v27 = vsub.f32 %v1293_v33, %v162_v37  ;;  %v1298_v49 = vld [vmem:[#allocation13_spill] sm:$0xff] }
  0x57   :  { %537 = vst [vmem:[%s1220_s3 + $0x38] sm:$0xff] %v525_v22  ;;  %v177_v6 = vsub.f32 %v1294_v50, %v164_v43  ;;  %v178_v56 = vsub.f32 %v1295_v29, %v166_v10  ;;  %v482_v39 = vsub.f32 %v1296_v42, %v1059_v16  ;;  %v483_v57 = vsub.f32 %v1297_v24, %v1061_v48 }
  0x58   :  { %v309_v32 = vmul.f32 %v1298_v49, %v175_v55  ;;  %v310_v25 = vmul.f32 %v1299_v34, %v176_v27  ;;  %v484_v37 = vsub.f32 %v1300_v26, %v157_v35  ;;  %v485_v62 = vsub.f32 %v1301_v58, %v158_v46 }
  0x59   :  { %v311_v38 = vmul.f32 %v1302_v30, %v177_v6  ;;  %v312_v43 = vmul.f32 %v1303_v4, %v178_v56  ;;  %v494_v63 = vand.u32 2147483647, %v482_v39  ;;  %v495_v10 = vand.u32 2147483647, %v483_v57 }
  0x5a   :  { %v314_v40 = vsel %vm35_vm1, %v309_v32, 0.0  ;;  %v323_v16 = vsel %vm35_vm1, %v310_v25, 0.0  ;;  %v496_v3 = vand.u32 2147483647, %v484_v37  ;;  %v497_v48 = vand.u32 2147483647, %v485_v62 }
  0x5b   :  { %v315_v1 = vadd.f32 %v314_v40, %v313_v8  ;;  %v324_v31 = vadd.f32 %v323_v16, %v322_v53  ;;  %v332_v19 = vsel %vm35_vm1, %v311_v38, 0.0  ;;  %v341_v52 = vsel %vm35_vm1, %v312_v43, 0.0 }
  0x5c   :  { %v333_v14 = vadd.f32 %v332_v19, %v331_v9  ;;  %v342_v15 = vadd.f32 %v341_v52, %v340_v17  ;;  %v526_v7 = vsel %vm1030_vm14, %v494_v63, -1.0  ;;  %v527_v47 = vsel %vm1037_vm15, %v495_v10, -1.0 }
  0x5d   :  { %v528_v20 = vsel %vm1044_vm0, %v496_v3, -1.0  ;;  %v529_v13 = vsel %vm1051_vm2, %v497_v48, -1.0  ;;  %538 = vst [vmem:[%s1220_s3 + $0x40] sm:$0xf] %v526_v7  ;;  %539 = vst [vmem:[%s1220_s3 + $0x48] sm:$0xf] %v527_v47 }
  0x5e   :  { %540 = vst [vmem:[%s1220_s3 + $0x50] sm:$0xf] %v528_v20  ;;  %541 = vst [vmem:[%s1220_s3 + $0x58] sm:$0xf] %v529_v13  ;;  %v316_v28 = vrot.slane %v315_v1, 4  ;;  %v325_v41 = vrot.slane %v324_v31, 4 }
  0x5f   :  { %v334_v12 = vrot.slane %v333_v14, 4  ;;  %v343_v36 = vrot.slane %v342_v15, 4  ;;  %v618_v16 = vmov 1966171168  }
  0x60   :  { %v317_v8 = vadd.f32 %v316_v28, %v315_v1  ;;  %v326_v53 = vadd.f32 %v325_v41, %v324_v31  ;;  %v389_v3 = vunpack.c.l.s4 %v618_v16 }
  0x61   :  { %v335_v11 = vadd.f32 %v334_v12, %v333_v14  ;;  %v344_v18 = vadd.f32 %v343_v36, %v342_v15 }
  0x62   :  { %v318_v9 = vrot.slane %v317_v8, 2  ;;  %v327_v17 = vrot.slane %v326_v53, 2  ;;  %v390_v41 = vunpack.c.0.s8 %v389_v3 }
  0x63   :  { %v336_v54 = vrot.slane %v335_v11, 2  ;;  %v345_v0 = vrot.slane %v344_v18, 2 }
  0x64   :  { %v319_v33 = vadd.f32 %v318_v9, %v317_v8  ;;  %v328_v27 = vadd.f32 %v327_v17, %v326_v53 }
  0x65   :  { %v337_v50 = vadd.f32 %v336_v54, %v335_v11  ;;  %v346_v6 = vadd.f32 %v345_v0, %v344_v18 }
  0x66   :  { %v320_v38 = vrot.slane %v319_v33, 1 }
  0x68   :  { %v321_v52 = vadd.f32 %v320_v38, %v319_v33  ;;  %v1304_v33 = vld [vmem:[#allocation2_spill] sm:$0xff] }
  0x6a   :  { %v349_v11 = vsub.f32 0.0, %v321_v52 }
  0x81   :  { %v251_v22 = vpop.permute.xlu1 %250 }
  0x82   :  { %v241_v35 = vpop.permute.xlu0 %240  ;;  %v261_v5 = vmul.f32 %v1298_v49, %v251_v22  ;;  %v262_v46 = vmul.f32 %v1299_v34, %v251_v22  ;;  %v263_v23 = vmul.f32 %v1302_v30, %v251_v22  ;;  %v264_v55 = vmul.f32 %v1303_v4, %v251_v22 }
  0x83   :  { %v253_v29 = vmul.f32 %v804_v59, %v241_v35  ;;  %v254_v56 = vmul.f32 %v807_v60, %v241_v35  ;;  %v255_v42 = vmul.f32 %v810_v61, %v241_v35  ;;  %v256_v39 = vmul.f32 %v813_v2, %v241_v35 }
  0x84   :  { %v266_v25 = vsel %vm35_vm1, %v261_v5, 0.0  ;;  %v275_v26 = vsel %vm35_vm1, %v262_v46, 0.0  ;;  %v284_v59 = vsel %vm35_vm1, %v263_v23, 0.0  ;;  %v293_v60 = vsel %vm35_vm1, %v264_v55, 0.0 }
  0x85   :  { %v338_v4 = vrot.slane %v337_v50, 1 }
  0x86   :  { %v246_v24 = vpop.permute.xlu0 %245 }
  0x87   :  { %v257_v57 = vmul.f32 %v856_v44, %v246_v24  ;;  %v258_v49 = vmul.f32 %v859_v45, %v246_v24  ;;  %v259_v32 = vmul.f32 %v1288_v21, %v246_v24  ;;  %v260_v34 = vmul.f32 %v1289_v51, %v246_v24  ;;  %v1306_v24 = vld [vmem:[#allocation4_spill] sm:$0xff] }
  0x88   :  { %v329_v21 = vrot.slane %v328_v27, 1  ;;  %v347_v51 = vrot.slane %v346_v6, 1  ;;  %v339_v15 = vadd.f32 %v338_v4, %v337_v50  ;;  %v1309_v4 = vlaneseq }
  0x89   :  { %v265_v61 = vadd.f32 %v257_v57, %v253_v29  ;;  %v274_v37 = vadd.f32 %v258_v49, %v254_v56  ;;  %v283_v2 = vadd.f32 %v259_v32, %v255_v42  ;;  %v292_v58 = vadd.f32 %v260_v34, %v256_v39  ;;  %v1305_v42 = vld [vmem:[#allocation3_spill] sm:$0xff]  ;;  %v1307_v49 = vld [vmem:[#allocation5_spill] sm:$0xff]  ;;  %v1308_v34 = vld [vmem:[#allocation6_spill] sm:$0xff] }
  0x8a   :  { %v330_v14 = vadd.f32 %v329_v21, %v328_v27  ;;  %v348_v7 = vadd.f32 %v347_v51, %v346_v6  ;;  %v351_v9 = vsub.f32 0.0, %v339_v15  ;;  %v393_v27 = vsub.s32 %v390_v41, %v1304_v33 }
  0x8b   :  { %v267_v62 = vadd.f32 %v266_v25, %v265_v61  ;;  %v276_v44 = vadd.f32 %v275_v26, %v274_v37  ;;  %v285_v30 = vadd.f32 %v284_v59, %v283_v2  ;;  %v294_v45 = vadd.f32 %v293_v60, %v292_v58 }
  0x8c   :  { %v350_v18 = vsub.f32 0.0, %v330_v14  ;;  %v352_v17 = vsub.f32 0.0, %v348_v7  ;;  %vm413_vm1 = vcmp.lt.s32.totalorder %v1309_v4, 512 }
  0x8d   :  { %v268_v43 = vrot.slane %v267_v62, 4  ;;  %v277_v63 = vrot.slane %v276_v44, 4  ;;  %v286_v10 = vrot.slane %v285_v30, 4  ;;  %v295_v40 = vrot.slane %v294_v45, 4 }
  0x8f   :  { %v269_v48 = vadd.f32 %v268_v43, %v267_v62  ;;  %v278_v1 = vadd.f32 %v277_v63, %v276_v44  ;;  %v287_v31 = vadd.f32 %v286_v10, %v285_v30  ;;  %v296_v19 = vadd.f32 %v295_v40, %v294_v45 }
  0x91   :  { %v270_v47 = vrot.slane %v269_v48, 2  ;;  %v279_v20 = vrot.slane %v278_v1, 2  ;;  %v288_v13 = vrot.slane %v287_v31, 2  ;;  %v297_v28 = vrot.slane %v296_v19, 2 }
  0x93   :  { %v271_v12 = vadd.f32 %v270_v47, %v269_v48  ;;  %v280_v36 = vadd.f32 %v279_v20, %v278_v1  ;;  %v289_v8 = vadd.f32 %v288_v13, %v287_v31  ;;  %v298_v53 = vadd.f32 %v297_v28, %v296_v19 }
  0x95   :  { %v272_v54 = vrot.slane %v271_v12, 1  ;;  %v281_v0 = vrot.slane %v280_v36, 1  ;;  %v290_v35 = vrot.slane %v289_v8, 1  ;;  %v299_v22 = vrot.slane %v298_v53, 1 }
  0x97   :  { %v273_v5 = vadd.f32 %v272_v54, %v271_v12  ;;  %v282_v46 = vadd.f32 %v281_v0, %v280_v36  ;;  %v291_v23 = vadd.f32 %v290_v35, %v289_v8  ;;  %v300_v55 = vadd.f32 %v299_v22, %v298_v53 }
  0x99   :  { %v353_v50 = vmul.f32 %v349_v11, %v273_v5  ;;  %v354_v6 = vmul.f32 %v350_v18, %v282_v46  ;;  %v355_v29 = vmul.f32 %v351_v9, %v291_v23  ;;  %v356_v56 = vmul.f32 %v352_v17, %v300_v55 }
  0x9a   :  { %v416_v39 = vmul.f32 %v1305_v42, %v273_v5  ;;  %v417_v57 = vmul.f32 %v1306_v24, %v282_v46  ;;  %v418_v32 = vmul.f32 %v1307_v49, %v291_v23  ;;  %v419_v25 = vmul.f32 %v1308_v34, %v300_v55 }
  0x9b   :  { %v378_v26 = vmul.f32 %v1305_v42, %v353_v50  ;;  %v379_v59 = vmul.f32 %v1306_v24, %v354_v6  ;;  %v380_v60 = vmul.f32 %v1307_v49, %v355_v29  ;;  %v381_v61 = vmul.f32 %v1308_v34, %v356_v56 }
  0x9c   :  { %v424_v37 = vcombine.low %v416_v39, %v417_v57  ;;  %v425_v2 = vcombine.low %v418_v32, %v419_v25 }
  0x9d   :  { %v386_v58 = vcombine.low %v378_v26, %v379_v59  ;;  %v387_v62 = vcombine.low %v380_v60, %v381_v61 }
  0x9e   :  { %v432_v44 = vrot.slane %v424_v37, %v393_v27  ;;  %v439_v30 = vrot.slane %v425_v2, %v393_v27 }
  0x9f   :  { %v394_v45 = vrot.slane %v386_v58, %v393_v27  ;;  %v401_v38 = vrot.slane %v387_v62, %v393_v27 }
  0xa0   :  { %v440_v21 = vcombine.low %v432_v44, %v439_v30 }
  0xa1   :  { %v402_v51 = vcombine.low %v394_v45, %v401_v38 }
  0xa2   :  { %v447_v43 = vrot.slane %v440_v21, %v393_v27 }
  0xa3   :  { %v409_v63 = vrot.slane %v402_v51, %v393_v27 }
  0xa4   :  { %449 = vst.msk [vmem:[%s1221_s6] sm:$0xf] %vm413_vm1, %v447_v43 }
  0xa5   :  { %415 = vst.msk [vmem:[%s1222_s5] sm:$0xf] %vm413_vm1, %v409_v63 }

</bundles_post_ra>
